<compile_context>
chip_gen: v5e
topology: v5e:2x2
jax: 0.10.0
libtpu: 0.0.40
codegen_flags: <defaults>
</compile_context>

<pallas_src>
import functools

import jax
import jax.numpy as jnp
from jax.experimental import pallas as pl
from jax.experimental.pallas import tpu as pltpu


def _round_up(x, m):
    return (x + m - 1) // m * m


def bigram_kernel(idx_ref, tgt_ref, table_ref, logits_ref, loss_ref, *,
                  vocab, n_rows, block_rows, v_pad):
    # idx_ref    : VMEM (R, 1)      int32  token ids for this row block
    # tgt_ref    : VMEM (R, 1)      int32  target ids for this row block
    # table_ref  : VMEM (Vp, Vp)    f32    padded bigram table (resident)
    # logits_ref : VMEM (R, Vp)     f32    this block's rows of the logits
    # loss_ref   : VMEM (1, 128)    f32    this block's partial loss sum
    i = pl.program_id(0)
    r = block_rows

    idx_blk = idx_ref[...]                       # (R, 1)
    tgt_blk = tgt_ref[...]                       # (R, 1)

    # Vectorized embedding row gather: one-hot @ table on the MXU.
    col = jax.lax.broadcasted_iota(jnp.int32, (r, v_pad), 1)
    one_hot = (col == idx_blk).astype(jnp.float32)           # (R, Vp)
    logits = jnp.dot(one_hot, table_ref[...],
                     preferred_element_type=jnp.float32)      # (R, Vp)
    logits_ref[...] = logits                                  # dense tile store

    # Cross-entropy per row: logsumexp(logits[:vocab]) - logits[target].
    masked = jnp.where(col < vocab, logits, jnp.float32(-1e30))
    m = jnp.max(masked, axis=-1, keepdims=True)
    lse = m + jnp.log(jnp.sum(jnp.exp(masked - m), axis=-1, keepdims=True))

    tgt_logit = jnp.sum(jnp.where(col == tgt_blk, logits, 0.0),
                        axis=-1, keepdims=True)               # (R, 1)

    # Zero out contributions from padded rows (row index >= N).
    row_id = i * r + jax.lax.broadcasted_iota(jnp.int32, (r, 1), 0)
    per_row = jnp.where(row_id < n_rows, lse - tgt_logit, 0.0)

    partial = jnp.sum(per_row)                                # scalar
    loss_ref[...] = partial * jnp.ones((1, 128), jnp.float32)


def bigram_forward(idx, targets, table, *, block_rows=512):
    """Pallas forward: returns (logits (B*T, V) f32, mean CE loss scalar)."""
    B, T = idx.shape
    V = table.shape[0]
    N = B * T

    v_pad = _round_up(V, 128)                 # lane-dense logits / MXU friendly
    r = min(block_rows, _round_up(N, 8))      # rows per grid step (mult. of 8)
    n_pad = _round_up(N, r)
    g = n_pad // r

    # Wrapper-side layout plumbing (free): flatten + pad indices and table.
    idx_col = jnp.zeros((n_pad, 1), jnp.int32).at[:N, 0].set(
        idx.reshape(N).astype(jnp.int32))
    tgt_col = jnp.zeros((n_pad, 1), jnp.int32).at[:N, 0].set(
        targets.reshape(N).astype(jnp.int32))
    table_pad = jnp.zeros((v_pad, v_pad), jnp.float32).at[:V, :V].set(
        table.astype(jnp.float32))

    kernel = functools.partial(bigram_kernel, vocab=V, n_rows=N,
                               block_rows=r, v_pad=v_pad)

    logits_pad, loss_parts = pl.pallas_call(
        kernel,
        out_shape=(
            jax.ShapeDtypeStruct((n_pad, v_pad), jnp.float32),
            jax.ShapeDtypeStruct((1, g * 128), jnp.float32),
        ),
        grid_spec=pltpu.PrefetchScalarGridSpec(
            num_scalar_prefetch=0,
            grid=(g,),
            in_specs=[
                pl.BlockSpec((r, 1), lambda i: (i, 0)),          # idx block
                pl.BlockSpec((r, 1), lambda i: (i, 0)),          # target block
                pl.BlockSpec((v_pad, v_pad), lambda i: (0, 0)),  # resident table
            ],
            out_specs=(
                pl.BlockSpec((r, v_pad), lambda i: (i, 0)),      # logits tile
                pl.BlockSpec((1, 128), lambda i: (0, i)),        # loss partial
            ),
        ),
        compiler_params=pltpu.CompilerParams(
            # Blocks are independent (per-block loss partials) -> parallel,
            # which lets Mosaic shard blocks across v7x's two TensorCores.
            dimension_semantics=("parallel",),
        ),
    )(idx_col, tgt_col, table_pad)

    logits = logits_pad[:N, :V]
    loss = jnp.sum(loss_parts.reshape(g, 128)[:, 0]) / N
    return logits, loss


def reference_forward(idx, targets, table):
    B, T = idx.shape
    logits = table[idx].reshape(B * T, -1)
    lse = jax.scipy.special.logsumexp(logits, axis=-1)
    tgt_logit = jnp.take_along_axis(
        logits, targets.reshape(-1, 1), axis=-1)[:, 0]
    loss = jnp.mean(lse - tgt_logit)
    return logits, loss


if __name__ == "__main__":
    vocab_size = 5
    B, T = 2, 8

    key = jax.random.PRNGKey(0)
    k_table, k_idx, k_tgt = jax.random.split(key, 3)

    # nn.Embedding default init: N(0, 1)
    table = jax.random.normal(k_table, (vocab_size, vocab_size), jnp.float32)
    idx = jax.random.randint(k_idx, (B, T), 0, vocab_size, jnp.int32)
    targets = jax.random.randint(k_tgt, (B, T), 0, vocab_size, jnp.int32)

    logits, loss = bigram_forward(idx, targets, table)
    jax.block_until_ready((logits, loss))

    ref_logits, ref_loss = reference_forward(idx, targets, table)
    assert jnp.allclose(logits, ref_logits, atol=1e-5), "logits mismatch"
    assert jnp.allclose(loss, ref_loss, atol=1e-5), "loss mismatch"

    print("KERNEL_OK")
</pallas_src>

<mosaic_0001>
module attributes {stable_mosaic.version = 11 : i64} {
  func.func @bigram_kernel(%arg0: i32, %arg1: memref<16x1xi32, #tpu.memory_space<vmem>>, %arg2: memref<16x1xi32, #tpu.memory_space<vmem>>, %arg3: memref<128x128xf32, #tpu.memory_space<vmem>>, %arg4: memref<16x128xf32, #tpu.memory_space<vmem>>, %arg5: memref<1x128xf32, #tpu.memory_space<vmem>>) attributes {dimension_semantics = [#tpu.dimension_semantics<parallel>], iteration_bounds = array<i64: 1>, scalar_prefetch = 0 : i64, scratch_operands = 0 : i64, tpu.core_type = #tpu.core_type<tc>, window_params = [{transform_indices = @transform_0, window_bounds = array<i64: 16, 1>}, {transform_indices = @transform_1, window_bounds = array<i64: 16, 1>}, {pipeline_mode = #tpu.pipeline_mode<synchronous>, transform_indices = @transform_2, window_bounds = array<i64: 128, 128>}, {transform_indices = @transform_3, window_bounds = array<i64: 16, 128>}, {transform_indices = @transform_4, window_bounds = array<i64: 1, 128>}]} {
    %c0 = arith.constant 0 : index
    %c0_0 = arith.constant 0 : index
    %0 = vector.load %arg1[%c0, %c0_0] : memref<16x1xi32, #tpu.memory_space<vmem>>, vector<16x1xi32>
    %c0_1 = arith.constant 0 : index
    %c0_2 = arith.constant 0 : index
    %1 = vector.load %arg2[%c0_1, %c0_2] : memref<16x1xi32, #tpu.memory_space<vmem>>, vector<16x1xi32>
    %2 = tpu.iota {dimensions = array<i32: 1>} : vector<16x128xi32>
    %3 = vector.broadcast %0 : vector<16x1xi32> to vector<16x128xi32>
    %4 = arith.cmpi eq, %2, %3 : vector<16x128xi32>
    %5 = arith.extui %4 : vector<16x128xi1> to vector<16x128xi32>
    %6 = arith.sitofp %5 : vector<16x128xi32> to vector<16x128xf32>
    %c0_3 = arith.constant 0 : index
    %c0_4 = arith.constant 0 : index
    %7 = vector.load %arg3[%c0_3, %c0_4] : memref<128x128xf32, #tpu.memory_space<vmem>>, vector<128x128xf32>
    %cst = arith.constant dense<0.000000e+00> : vector<16x128xf32>
    %8 = tpu.matmul %6, %7, %cst {dimension_numbers = #tpu.dot_dimension_numbers<[1], [0], [0], [1], [0, 0, 1, 1], [], []>} : vector<16x128xf32>, vector<128x128xf32>, vector<16x128xf32> -> vector<16x128xf32>
    %c0_5 = arith.constant 0 : index
    %c0_6 = arith.constant 0 : index
    %9 = vector.load %arg4[%c0_5, %c0_6] : memref<16x128xf32, #tpu.memory_space<vmem>>, vector<16x128xf32>
    tpu.vector_store %arg4[%c0_5, %c0_6], %8 {strides = array<i32>} : memref<16x128xf32, #tpu.memory_space<vmem>>, vector<16x128xf32>,
    %c5_i32 = arith.constant 5 : i32
    %10 = vector.broadcast %c5_i32 : i32 to vector<16x128xi32>
    %11 = arith.cmpi slt, %2, %10 : vector<16x128xi32>
    %cst_7 = arith.constant -1.000000e+30 : f32
    %12 = vector.broadcast %cst_7 : f32 to vector<16x128xf32>
    %13 = arith.select %11, %8, %12 : vector<16x128xi1>, vector<16x128xf32>
    %cst_8 = arith.constant dense<0xFF800000> : vector<16xf32>
    %14 = vector.multi_reduction <maximumf>, %13, %cst_8 [1] : vector<16x128xf32> to vector<16xf32>
    %15 = vector.shape_cast %14 : vector<16xf32> to vector<16x1xf32>
    %16 = vector.broadcast %15 : vector<16x1xf32> to vector<16x128xf32>
    %17 = arith.subf %13, %16 : vector<16x128xf32>
    %18 = math.exp %17 : vector<16x128xf32>
    %cst_9 = arith.constant dense<0.000000e+00> : vector<16xf32>
    %19 = vector.multi_reduction <add>, %18, %cst_9 [1] : vector<16x128xf32> to vector<16xf32>
    %20 = vector.shape_cast %19 : vector<16xf32> to vector<16x1xf32>
    %21 = math.log %20 : vector<16x1xf32>
    %22 = arith.addf %15, %21 : vector<16x1xf32>
    %23 = vector.broadcast %1 : vector<16x1xi32> to vector<16x128xi32>
    %24 = arith.cmpi eq, %2, %23 : vector<16x128xi32>
    %cst_10 = arith.constant 0.000000e+00 : f32
    %25 = vector.broadcast %cst_10 : f32 to vector<16x128xf32>
    %26 = arith.select %24, %8, %25 : vector<16x128xi1>, vector<16x128xf32>
    %cst_11 = arith.constant dense<0.000000e+00> : vector<16xf32>
    %27 = vector.multi_reduction <add>, %26, %cst_11 [1] : vector<16x128xf32> to vector<16xf32>
    %28 = vector.shape_cast %27 : vector<16xf32> to vector<16x1xf32>
    %c16_i32 = arith.constant 16 : i32
    %29 = arith.muli %arg0, %c16_i32 : i32
    %30 = tpu.iota {dimensions = array<i32: 0>} : vector<16x1xi32>
    %31 = vector.broadcast %29 : i32 to vector<16x1xi32>
    %32 = arith.addi %31, %30 : vector<16x1xi32>
    %c16_i32_12 = arith.constant 16 : i32
    %33 = vector.broadcast %c16_i32_12 : i32 to vector<16x1xi32>
    %34 = arith.cmpi slt, %32, %33 : vector<16x1xi32>
    %35 = arith.subf %22, %28 : vector<16x1xf32>
    %cst_13 = arith.constant 0.000000e+00 : f32
    %36 = vector.broadcast %cst_13 : f32 to vector<16x1xf32>
    %37 = arith.select %34, %35, %36 : vector<16x1xi1>, vector<16x1xf32>
    %38 = vector.shape_cast %37 : vector<16x1xf32> to vector<1x16x1xf32>
    %cst_14 = arith.constant dense<0.000000e+00> : vector<1xf32>
    %39 = vector.multi_reduction <add>, %38, %cst_14 [1, 2] : vector<1x16x1xf32> to vector<1xf32>
    %40 = vector.shape_cast %39 : vector<1xf32> to vector<1x1x1xf32>
    %41 = vector.extract %40[0, 0, 0] : f32 from vector<1x1x1xf32>
    %cst_15 = arith.constant 1.000000e+00 : f32
    %42 = vector.broadcast %cst_15 : f32 to vector<1x128xf32>
    %43 = vector.broadcast %41 : f32 to vector<1x128xf32>
    %44 = arith.mulf %43, %42 : vector<1x128xf32>
    %c0_16 = arith.constant 0 : index
    %c0_17 = arith.constant 0 : index
    %45 = vector.load %arg5[%c0_16, %c0_17] : memref<1x128xf32, #tpu.memory_space<vmem>>, vector<1x128xf32>
    tpu.vector_store %arg5[%c0_16, %c0_17], %44 {strides = array<i32>} : memref<1x128xf32, #tpu.memory_space<vmem>>, vector<1x128xf32>,
    return
  }
  func.func @transform_0(%arg0: i32) -> (i32, i32) {
    %c0_i32 = arith.constant 0 : i32
    %c0_i32_0 = arith.constant 0 : i32
    return %arg0, %c0_i32 : i32, i32
  }
  func.func @transform_1(%arg0: i32) -> (i32, i32) {
    %c0_i32 = arith.constant 0 : i32
    %c0_i32_0 = arith.constant 0 : i32
    return %arg0, %c0_i32 : i32, i32
  }
  func.func @transform_2(%arg0: i32) -> (i32, i32) {
    %c0_i32 = arith.constant 0 : i32
    %c0_i32_0 = arith.constant 0 : i32
    %c0_i32_1 = arith.constant 0 : i32
    return %c0_i32, %c0_i32_0 : i32, i32
  }
  func.func @transform_3(%arg0: i32) -> (i32, i32) {
    %c0_i32 = arith.constant 0 : i32
    %c0_i32_0 = arith.constant 0 : i32
    return %arg0, %c0_i32 : i32, i32
  }
  func.func @transform_4(%arg0: i32) -> (i32, i32) {
    %c0_i32 = arith.constant 0 : i32
    %c0_i32_0 = arith.constant 0 : i32
    return %c0_i32, %arg0 : i32, i32
  }
}

</mosaic_0001>

<bundles_post_ra>
// kernel: tpu_custom_call.1
= control target key start
LH: loop header
LB: loop body
LE: loop exit
PB: predicated region body
PF: predicated region fallthrough
CT: control target
= control target key end

     0   :  { %10 = vsyncpa [#allocation3], 0  ;;  %s369_s0 = inlined_call_operand.vmem [shape: s32[16,1], index: 0, kind: input, shape index: {}]   ;;  %s370_s1 = inlined_call_operand.vmem [shape: s32[16,1], index: 1, kind: input, shape index: {}]   ;;  %s371_s2 = inlined_call_operand.hbm [shape: f32[128,128], index: 2, kind: input, shape index: {}]   ;;  %s372_s3 = inlined_call_operand.hbm [shape: f32[16,128], index: 3, kind: output, shape index: {0}]   ;;  %s373_s4 = inlined_call_operand.hbm [shape: f32[1,128], index: 4, kind: output, shape index: {1}]  }
   0x1   :  { %11 = vsyncpa [#allocation4], 0 }
   0x2   :  { %12 = vsyncpa [#allocation7], 0  ;;  %s21_s17 = sshll.u32 %s371_s2, 4  ;;  %s310_s18 = smov [#allocation2]   ;;  %s22_s17 = int_to_ptr.hbm [resolvable:$true] %s21_s17 }
   0x3   :  { %s23_s19 = sshll.u32 %s310_s18, 4  ;;  %s311_s20 = smov 128   ;;  %s24_s19 = int_to_ptr.vmem [resolvable:$true] %s23_s19 }
   0x4   :  { %s312_s21 = smov 8  }
   0x5   :  { %29 = dma.hbm_to_vmem [thread:$0]  %s22_s17, 2048, %s24_s19, [#allocation3], %s311_s20, %s311_s20, %s312_s21  }
   0x6   :  { %304 = dma.done.wait [#allocation3], 2048  }
   0x7   :  { %305 = vsyncadd [#allocation3], 4294965248  ;;  %v313_v0 = vmov 0   ;;  %v34_v1 = vld [vmem:[%s369_s0] sm:$0xff]  ;;  %v67_v2 = vld [vmem:[#allocation2 + $0x78] sm:$0xff]  ;;  %v38_v21 = vlaneseq  ;;  %v314_v24 = vmov 1.0  }
   0x8   :  { %222 = vset.pattern.permute.xlu0 %v313_v0  ;;  %223 = vset.pattern.permute.xlu2 %v313_v0  ;;  %v66_v3 = vld [vmem:[#allocation2 + $0x70] sm:$0xff]  ;;  %v65_v4 = vld [vmem:[#allocation2 + $0x68] sm:$0xff]  ;;  %v64_v5 = vld [vmem:[#allocation2 + $0x60] sm:$0xff]  ;;  %vm143_vm5 = vcmask 7168   ;;  %s164_s5 = sshll.u32 %s372_s3, 4  ;;  %s316_s6 = smov [#allocation6]   ;;  %s165_s5 = int_to_ptr.hbm [resolvable:$true] %s164_s5 }
   0x9   :  { %41 = vperm.xlu0 %222, %v34_v1   ;;  %68 = vmatpush.msra.mxu0 %v67_v2  ;;  %v35_v6 = vld [vmem:[%s369_s0 + $0x8] sm:$0xff]  ;;  %v63_v7 = vld [vmem:[#allocation2 + $0x58] sm:$0xff]  ;;  %v62_v8 = vld [vmem:[#allocation2 + $0x50] sm:$0xff]  ;;  %v39_v22 = vand.u32 127, %v38_v21  ;;  %s176_s7 = sshll.u32 %s316_s6, 4  ;;  %s178_s3 = sshll.u32 %s373_s4, 4  ;;  %s177_s7 = int_to_ptr.vmem [resolvable:$true] %s176_s7  ;;  %s179_s3 = int_to_ptr.hbm [resolvable:$true] %s178_s3 }
   0xa   :  { %197 = vmatpush.msra.mxu1 %v67_v2  ;;  %v61_v9 = vld [vmem:[#allocation2 + $0x48] sm:$0xff]  ;;  %v60_v10 = vld [vmem:[#allocation2 + $0x40] sm:$0xff]  ;;  %v59_v11 = vld [vmem:[#allocation2 + $0x38] sm:$0xff] }
   0xb   :  { %69 = vmatpush.msra.mxu0 %v66_v3  ;;  %v58_v12 = vld [vmem:[#allocation2 + $0x30] sm:$0xff]  ;;  %v57_v13 = vld [vmem:[#allocation2 + $0x28] sm:$0xff]  ;;  %v56_v14 = vld [vmem:[#allocation2 + $0x20] sm:$0xff]  ;;  %vm93_vm3 = vcmp.lt.s32.totalorder %v39_v22, 5 }
   0xc   :  { %198 = vmatpush.msra.mxu1 %v66_v3  ;;  %v55_v15 = vld [vmem:[#allocation2 + $0x18] sm:$0xff]  ;;  %v54_v16 = vld [vmem:[#allocation2 + $0x10] sm:$0xff]  ;;  %v53_v17 = vld [vmem:[#allocation2 + $0x8] sm:$0xff] }
   0xd   :  { %70 = vmatpush.msra.mxu0 %v65_v4  ;;  %v52_v18 = vld [vmem:[#allocation2] sm:$0xff]  ;;  %v37_v20 = vld [vmem:[%s370_s1 + $0x8] sm:$0xff] }
   0xe   :  { %199 = vmatpush.msra.mxu1 %v65_v4  ;;  %v36_v19 = vld [vmem:[%s370_s1] sm:$0xff]  ;;  %s315_s1 = smov [#allocation5]  }
   0xf   :  { %71 = vmatpush.msra.mxu0 %v64_v5  ;;  %117 = vperm.xlu2 %223, %v36_v19   ;;  %s162_s28 = sshll.u32 %s315_s1, 4  ;;  %s163_s28 = int_to_ptr.vmem [resolvable:$true] %s162_s28 }
  0x10   :  { %200 = vmatpush.msra.mxu1 %v64_v5 }
  0x11   :  { %44 = vperm.xlu0 %222, %v35_v6   ;;  %72 = vmatpush.msra.mxu0 %v63_v7 }
  0x12   :  { %201 = vmatpush.msra.mxu1 %v63_v7 }
  0x13   :  { %73 = vmatpush.msra.mxu0 %v62_v8 }
  0x14   :  { %202 = vmatpush.msra.mxu1 %v62_v8 }
  0x15   :  { %74 = vmatpush.msra.mxu0 %v61_v9 }
  0x16   :  { %203 = vmatpush.msra.mxu1 %v61_v9 }
  0x17   :  { %75 = vmatpush.msra.mxu0 %v60_v10  ;;  %120 = vperm.xlu2 %223, %v37_v20  }
  0x18   :  { %204 = vmatpush.msra.mxu1 %v60_v10 }
  0x19   :  { %76 = vmatpush.msra.mxu0 %v59_v11 }
  0x1a   :  { %205 = vmatpush.msra.mxu1 %v59_v11 }
  0x1b   :  { %77 = vmatpush.msra.mxu0 %v58_v12 }
  0x1c   :  { %206 = vmatpush.msra.mxu1 %v58_v12 }
  0x1d   :  { %78 = vmatpush.msra.mxu0 %v57_v13 }
  0x1e   :  { %207 = vmatpush.msra.mxu1 %v57_v13 }
  0x1f   :  { %79 = vmatpush.msra.mxu0 %v56_v14 }
  0x20   :  { %208 = vmatpush.msra.mxu1 %v56_v14 }
  0x21   :  { %80 = vmatpush.msra.mxu0 %v55_v15 }
  0x22   :  { %209 = vmatpush.msra.mxu1 %v55_v15 }
  0x23   :  { %81 = vmatpush.msra.mxu0 %v54_v16 }
  0x24   :  { %210 = vmatpush.msra.mxu1 %v54_v16 }
  0x25   :  { %82 = vmatpush.msra.mxu0 %v53_v17 }
  0x26   :  { %211 = vmatpush.msra.mxu1 %v53_v17 }
  0x27   :  { %83 = vmatpush.msra.mxu0 %v52_v18 }
  0x28   :  { %212 = vmatpush.msra.mxu1 %v52_v18 }
  0x69   :  { %v118_v26 = vpop.permute.xlu2 %117 }
  0x6a   :  { %vm122_vm2 = vcmp.eq.s32.totalorder %v39_v22, %v118_v26 }
  0x71   :  { %v121_v40 = vpop.permute.xlu2 %120 }
  0x72   :  { %vm123_vm4 = vcmp.eq.s32.totalorder %v39_v22, %v121_v40 }
  0x7b   :  { %v42_v23 = vpop.permute.xlu0 %41 }
  0x7c   :  { %vm46_vm0 = vcmp.eq.s32.totalorder %v39_v22, %v42_v23 }
  0x7d   :  { %195 = vmatmul.msk.f32.vlgmr.msra.gmra.mxu0 %vm46_vm0, %v314_v24 }
  0x83   :  { %v45_v25 = vpop.permute.xlu0 %44 }
  0x84   :  { %vm47_vm1 = vcmp.eq.s32.totalorder %v39_v22, %v45_v25 }
  0x85   :  { %196 = vmatmul.msk.f32.vlgmr.msra.gmra.mxu1 %vm47_vm1, %v314_v24 }
  0xfa   :  { %v85_v27 = vpop.f32.mrf.mxu0 }
  0xfb   :  { %91 = vst [vmem:[#allocation5] sm:$0xff] %v85_v27  ;;  %v124_v28 = vsel %vm122_vm2, %v85_v27, 0.0  ;;  %v94_v29 = vsel %vm93_vm3, %v85_v27, -1e+30 }
  0xfc   :  { %126 = vadd.xlane.f32.xlu2 %v124_v28  ;;  %96 = vmax.xlane.f32.xlu1 %v94_v29 }
 0x102   :  { %v88_v30 = vpop.f32.mrf.mxu1 }
 0x103   :  { %92 = vst [vmem:[#allocation5 + $0x8] sm:$0xff] %v88_v30  ;;  %v95_v31 = vsel %vm93_vm3, %v88_v30, -1e+30  ;;  %v125_v41 = vsel %vm123_vm4, %v88_v30, 0.0 }
 0x104   :  { %98 = vmax.xlane.f32.xlu1 %v95_v31  ;;  %170 = dma.vmem_to_hbm [thread:$0]  %s163_s28, 256, %s165_s5, [#allocation4], %s311_s20, %s311_s20, %s312_s21  }
 0x16f   :  { %v97_v32 = vpop.xlane.xlu1 %96  ;;  %v127_v49 = vpop.xlane.xlu2 %126 }
 0x170   :  { %v100_v33 = vsub.f32 %v94_v29, %v97_v32 }
 0x172   :  { %v102_v34 = vmul.f32 1.442695, %v100_v33 }
 0x174   :  { %224 = vpow2.f32 %v102_v34 }
 0x177   :  { %v99_v35 = vpop.xlane.xlu1 %98 }
 0x178   :  { %v101_v36 = vsub.f32 %v95_v31, %v99_v35 }
 0x17a   :  { %v225_v37 = vpop.eup %224  ;;  %v104_v38 = vmul.f32 1.442695, %v101_v36 }
 0x17b   :  { %106 = vadd.xlane.f32.xlu0 %v225_v37 }
 0x17c   :  { %226 = vpow2.f32 %v104_v38 }
 0x182   :  { %v227_v39 = vpop.eup %226 }
 0x183   :  { %108 = vadd.xlane.f32.xlu1 %v227_v39 }
 0x18b   :  { %128 = vadd.xlane.f32.xlu1 %v125_v41 }
 0x1ee   :  { %v107_v42 = vpop.xlane.xlu0 %106 }
 0x1ef   :  { %228 = vlog2.f32 %v107_v42 }
 0x1f5   :  { %v229_v43 = vpop.eup %228 }
 0x1f6   :  { %v109_v44 = vpop.xlane.xlu1 %108  ;;  %v111_v45 = vmul.f32 0.6931472, %v229_v43 }
 0x1f7   :  { %230 = vlog2.f32 %v109_v44 }
 0x1f8   :  { %v114_v46 = vadd.f32 %v111_v45, %v97_v32 }
 0x1fa   :  { %v139_v51 = vsub.f32 %v114_v46, %v127_v49 }
 0x1fc   :  { %v144_v54 = vsel %vm143_vm5, %v139_v51, 0.0 }
 0x1fd   :  { %v231_v47 = vpop.eup %230 }
 0x1fe   :  { %v113_v48 = vmul.f32 0.6931472, %v231_v47  ;;  %v129_v52 = vpop.xlane.xlu1 %128 }
 0x200   :  { %v115_v50 = vadd.f32 %v113_v48, %v99_v35 }
 0x202   :  { %v140_v53 = vsub.f32 %v115_v50, %v129_v52 }
 0x204   :  { %v145_v55 = vsel %vm143_vm5, %v140_v53, 0.0 }
 0x205   :  { %v146_v56 = vadd.f32 %v145_v55, %v144_v54 }
 0x207   :  { %147 = vadd.xlane.f32.xlu1 %v146_v56 }
 0x27a   :  { %v148_v57 = vpop.xlane.xlu1 %147 }
 0x27b   :  { %v149_v58 = vrot.slane %v148_v57, 4 }
 0x27d   :  { %v150_v59 = vadd.f32 %v149_v58, %v148_v57 }
 0x27f   :  { %v151_v60 = vrot.slane %v150_v59, 2 }
 0x281   :  { %v152_v61 = vadd.f32 %v151_v60, %v150_v59 }
 0x283   :  { %v153_v62 = vrot.slane %v152_v61, 1 }
 0x285   :  { %v154_v63 = vadd.f32 %v153_v62, %v152_v61 }
 0x287   :  { %213 = vpush %v154_v63 }
 0x2b8   :  { %s214_s10 = spop %213 }
 0x2b9   :  { %v156_v0 = vstv %s214_s10 }
 0x2ba   :  { %157 = vst [vmem:[#allocation6] sm:$0x1] %v156_v0 }
 0x2bb   :  { %181 = dma.vmem_to_hbm [thread:$0]  %s177_s7, 16, %s179_s3, [#allocation7]  }
 0x2bc   :  { %306 = dma.done.wait [#allocation4], 256  }
 0x2bd   :  { %307 = vsyncadd [#allocation4], 4294967040 }
 0x2be   :  { %308 = dma.done.wait [#allocation7], 16  }
 0x2bf   :  { %309 = vsyncadd [#allocation7], 4294967280 }
 0x2c0   :  { %190 = vsyncpa [#allocation3], 1 }
 0x2c1   :  { %191 = vsyncpa [#allocation4], 1 }
 0x2c2   :  { %192 = vsyncpa [#allocation7], 1 }

</bundles_post_ra>
